<compile_context>
chip_gen: v7x
topology: tpu7x:2x2x1
jax: 0.10.0
libtpu: 0.0.40
codegen_flags: <defaults>
</compile_context>

<pallas_src>
import functools

import jax
import jax.numpy as jnp
from jax.experimental import pallas as pl
from jax.experimental.pallas import tpu as pltpu

INPUT_DIM = 164          # logical feature dim of the PyTorch module
LATENT_DIM = 128
HIDDEN_DIM = 256
PAD_IN = 256             # INPUT_DIM padded up to a multiple of 128 (lane-dense)
NEG_INF = -1e30


def _round_up(n, m):
    return ((n + m - 1) // m) * m


def _vae_kernel(x_ref, eps_ref,
                w1_ref, b1_ref, w2_ref, b2_ref,
                w3_ref, b3_ref, w4_ref, b4_ref,
                recon_ref, mean_ref, logvar_ref,
                *, latent_dim):
    # ---------------- encoder ----------------
    x = x_ref[...].astype(jnp.bfloat16)                               # [TM, PAD_IN]
    h = jnp.dot(x, w1_ref[...], preferred_element_type=jnp.float32) + b1_ref[...]
    h = jnp.maximum(h, 0.0)                                            # ReLU (f32, VPU)
    enc = jnp.dot(h.astype(jnp.bfloat16), w2_ref[...],
                  preferred_element_type=jnp.float32) + b2_ref[...]    # [TM, 2*latent]

    mean = enc[:, :latent_dim]                                         # torch.chunk(.., 2, -1)
    logvar = enc[:, latent_dim:]

    # ---------------- reparameterize ----------------
    std = jnp.exp(0.5 * logvar)
    z = mean + eps_ref[...] * std

    # ---------------- decoder ----------------
    h2 = jnp.dot(z.astype(jnp.bfloat16), w3_ref[...],
                 preferred_element_type=jnp.float32) + b3_ref[...]
    h2 = jnp.maximum(h2, 0.0)                                          # ReLU
    # Padded columns of w4 are zero and padded columns of b4 hold -1e30, so the
    # padded logits carry zero softmax mass without any per-block masking work.
    logits = jnp.dot(h2.astype(jnp.bfloat16), w4_ref[...],
                     preferred_element_type=jnp.float32) + b4_ref[...]

    # Numerically stable softmax over the last dim.
    m = jnp.max(logits, axis=-1, keepdims=True)
    e = jnp.exp(logits - m)
    denom = jnp.sum(e, axis=-1, keepdims=True)
    recon = e * pl.reciprocal(denom, approx=True)                      # EUP vrcp

    recon_ref[...] = recon.astype(recon_ref.dtype)
    mean_ref[...] = mean.astype(mean_ref.dtype)
    logvar_ref[...] = logvar.astype(logvar_ref.dtype)


def vae_forward(x, eps, params, *, block_rows=512):
    """x: [B, INPUT_DIM] f32, eps: [B, LATENT_DIM] f32, params: dict of weights.

    Returns (recon [B, INPUT_DIM], mean [B, LATENT_DIM], logvar [B, LATENT_DIM]).
    """
    B = x.shape[0]
    # Batch tile: multiple of 8 (sublane), capped at block_rows so per-block
    # activations stay tiny even under v7x's 64 MiB VMEM.
    block_rows = max(8, (block_rows // 8) * 8)
    TM = min(block_rows, _round_up(B, 8))
    Bp = _round_up(B, TM)

    # ---- pad inputs (rows -> Bp, feature dim -> PAD_IN) ----
    x_p = jnp.zeros((Bp, PAD_IN), jnp.float32).at[:B, :INPUT_DIM].set(x)
    eps_p = jnp.zeros((Bp, LATENT_DIM), jnp.float32).at[:B, :].set(eps)

    # ---- pad + bf16-cast weights (f32 biases) ----
    w1 = jnp.zeros((PAD_IN, HIDDEN_DIM), jnp.float32).at[:INPUT_DIM, :].set(
        params["w1"]).astype(jnp.bfloat16)
    b1 = params["b1"].astype(jnp.float32)                                  # [1, 256]
    w2 = params["w2"].astype(jnp.bfloat16)                                 # [256, 256]
    b2 = params["b2"].astype(jnp.float32)                                  # [1, 256]
    w3 = params["w3"].astype(jnp.bfloat16)                                 # [128, 256]
    b3 = params["b3"].astype(jnp.float32)                                  # [1, 256]
    w4 = jnp.zeros((HIDDEN_DIM, PAD_IN), jnp.float32).at[:, :INPUT_DIM].set(
        params["w4"]).astype(jnp.bfloat16)
    # Real bias in the first 164 columns, -1e30 in the padded ones (softmax mask).
    b4 = jnp.full((1, PAD_IN), NEG_INF, jnp.float32).at[:, :INPUT_DIM].set(
        params["b4"])

    kernel = functools.partial(_vae_kernel, latent_dim=LATENT_DIM)

    const = lambda i: (0, 0)   # weights/biases: same block every grid step
    grid = (Bp // TM,)

    recon_p, mean_p, logvar_p = pl.pallas_call(
        kernel,
        out_shape=(
            jax.ShapeDtypeStruct((Bp, PAD_IN), jnp.float32),
            jax.ShapeDtypeStruct((Bp, LATENT_DIM), jnp.float32),
            jax.ShapeDtypeStruct((Bp, LATENT_DIM), jnp.float32),
        ),
        grid=grid,
        in_specs=[
            pl.BlockSpec((TM, PAD_IN), lambda i: (i, 0)),          # x
            pl.BlockSpec((TM, LATENT_DIM), lambda i: (i, 0)),      # eps
            pl.BlockSpec((PAD_IN, HIDDEN_DIM), const),             # w1
            pl.BlockSpec((1, HIDDEN_DIM), const),                  # b1
            pl.BlockSpec((HIDDEN_DIM, 2 * LATENT_DIM), const),     # w2
            pl.BlockSpec((1, 2 * LATENT_DIM), const),              # b2
            pl.BlockSpec((LATENT_DIM, HIDDEN_DIM), const),         # w3
            pl.BlockSpec((1, HIDDEN_DIM), const),                  # b3
            pl.BlockSpec((HIDDEN_DIM, PAD_IN), const),             # w4
            pl.BlockSpec((1, PAD_IN), const),                      # b4
        ],
        out_specs=(
            pl.BlockSpec((TM, PAD_IN), lambda i: (i, 0)),          # recon
            pl.BlockSpec((TM, LATENT_DIM), lambda i: (i, 0)),      # mean
            pl.BlockSpec((TM, LATENT_DIM), lambda i: (i, 0)),      # logvar
        ),
        compiler_params=pltpu.CompilerParams(
            dimension_semantics=("parallel",),
        ),
    )(x_p, eps_p, w1, b1, w2, b2, w3, b3, w4, b4)

    # Strip batch / feature padding.
    recon = recon_p[:B, :INPUT_DIM]
    mean = mean_p[:B, :]
    logvar = logvar_p[:B, :]
    return recon, mean, logvar


def vae_reference(x, eps, params):
    """Pure-JAX reference with the same bf16 matmul precision as the kernel."""
    def mm(a, w):
        return jnp.dot(a.astype(jnp.bfloat16), w.astype(jnp.bfloat16),
                       preferred_element_type=jnp.float32)

    h = jnp.maximum(mm(x, params["w1"]) + params["b1"], 0.0)
    enc = mm(h, params["w2"]) + params["b2"]
    mean, logvar = enc[:, :LATENT_DIM], enc[:, LATENT_DIM:]
    z = mean + eps * jnp.exp(0.5 * logvar)
    h2 = jnp.maximum(mm(z, params["w3"]) + params["b3"], 0.0)
    logits = mm(h2, params["w4"]) + params["b4"]
    recon = jax.nn.softmax(logits, axis=-1)
    return recon, mean, logvar


def init_params(key):
    """Deterministic synthetic parameters.

    PyTorch nn.Linear stores weight as [out, in]; we keep weights pre-transposed
    as [in, out] so the kernel does plain x @ W + b. Biases are [1, out] rows.
    """
    ks = jax.random.split(key, 8)

    def lin(kw, kb, fan_in, fan_out):
        bound = 1.0 / jnp.sqrt(fan_in)
        w = jax.random.uniform(kw, (fan_in, fan_out), jnp.float32, -bound, bound)
        b = jax.random.uniform(kb, (1, fan_out), jnp.float32, -bound, bound)
        return w, b

    w1, b1 = lin(ks[0], ks[1], INPUT_DIM, HIDDEN_DIM)        # encoder L1
    w2, b2 = lin(ks[2], ks[3], HIDDEN_DIM, LATENT_DIM * 2)   # encoder L2
    w3, b3 = lin(ks[4], ks[5], LATENT_DIM, HIDDEN_DIM)       # decoder L1
    w4, b4 = lin(ks[6], ks[7], HIDDEN_DIM, INPUT_DIM)        # decoder L2
    return dict(w1=w1, b1=b1, w2=w2, b2=b2, w3=w3, b3=b3, w4=w4, b4=b4)


if __name__ == "__main__":
    key = jax.random.PRNGKey(0)
    k_param, k_x, k_eps = jax.random.split(key, 3)

    B = 8
    x = jax.random.normal(k_x, (B, INPUT_DIM), jnp.float32)
    # torch.randn_like(std) replaced by a deterministic normal draw fed in.
    eps = jax.random.normal(k_eps, (B, LATENT_DIM), jnp.float32)

    params = init_params(k_param)

    recon, mean, logvar = vae_forward(x, eps, params)
    jax.block_until_ready((recon, mean, logvar))

    # Shape / sanity checks.
    assert recon.shape == (B, INPUT_DIM)
    assert mean.shape == (B, LATENT_DIM)
    assert logvar.shape == (B, LATENT_DIM)
    assert bool(jnp.all(jnp.isfinite(recon)))
    assert bool(jnp.all(jnp.isfinite(mean)))
    assert bool(jnp.all(jnp.isfinite(logvar)))
    assert bool(jnp.all(recon >= 0.0))
    assert jnp.allclose(jnp.sum(recon, axis=-1), 1.0, atol=5e-3)

    # Compare against a matched-precision pure-JAX reference (approx reciprocal
    # in the kernel -> slightly loose tolerance).
    r_ref, m_ref, lv_ref = vae_reference(x, eps, params)
    assert jnp.allclose(mean, m_ref, atol=2e-2, rtol=2e-2)
    assert jnp.allclose(logvar, lv_ref, atol=2e-2, rtol=2e-2)
    assert jnp.allclose(recon, r_ref, atol=2e-2)

    print("KERNEL_OK")
</pallas_src>

<mosaic_0001>
module attributes {stable_mosaic.version = 11 : i64} {
  func.func @_vae_kernel(%arg0: i32, %arg1: memref<8x256xf32, #tpu.memory_space<vmem>>, %arg2: memref<8x128xf32, #tpu.memory_space<vmem>>, %arg3: memref<256x256xbf16, #tpu.memory_space<vmem>>, %arg4: memref<1x256xf32, #tpu.memory_space<vmem>>, %arg5: memref<256x256xbf16, #tpu.memory_space<vmem>>, %arg6: memref<1x256xf32, #tpu.memory_space<vmem>>, %arg7: memref<128x256xbf16, #tpu.memory_space<vmem>>, %arg8: memref<1x256xf32, #tpu.memory_space<vmem>>, %arg9: memref<256x256xbf16, #tpu.memory_space<vmem>>, %arg10: memref<1x256xf32, #tpu.memory_space<vmem>>, %arg11: memref<8x256xf32, #tpu.memory_space<vmem>>, %arg12: memref<8x128xf32, #tpu.memory_space<vmem>>, %arg13: memref<8x128xf32, #tpu.memory_space<vmem>>) attributes {dimension_semantics = [#tpu.dimension_semantics<parallel>], iteration_bounds = array<i64: 1>, scalar_prefetch = 0 : i64, scratch_operands = 0 : i64, tpu.core_type = #tpu.core_type<tc>, window_params = [{transform_indices = @transform_0, window_bounds = array<i64: 8, 256>}, {transform_indices = @transform_1, window_bounds = array<i64: 8, 128>}, {pipeline_mode = #tpu.pipeline_mode<synchronous>, transform_indices = @transform_2, window_bounds = array<i64: 256, 256>}, {pipeline_mode = #tpu.pipeline_mode<synchronous>, transform_indices = @transform_3, window_bounds = array<i64: 1, 256>}, {pipeline_mode = #tpu.pipeline_mode<synchronous>, transform_indices = @transform_4, window_bounds = array<i64: 256, 256>}, {pipeline_mode = #tpu.pipeline_mode<synchronous>, transform_indices = @transform_5, window_bounds = array<i64: 1, 256>}, {pipeline_mode = #tpu.pipeline_mode<synchronous>, transform_indices = @transform_6, window_bounds = array<i64: 128, 256>}, {pipeline_mode = #tpu.pipeline_mode<synchronous>, transform_indices = @transform_7, window_bounds = array<i64: 1, 256>}, {pipeline_mode = #tpu.pipeline_mode<synchronous>, transform_indices = @transform_8, window_bounds = array<i64: 256, 256>}, {pipeline_mode = #tpu.pipeline_mode<synchronous>, transform_indices = @transform_9, window_bounds = array<i64: 1, 256>}, {transform_indices = @transform_10, window_bounds = array<i64: 8, 256>}, {transform_indices = @transform_11, window_bounds = array<i64: 8, 128>}, {transform_indices = @transform_12, window_bounds = array<i64: 8, 128>}]} {
    %c0 = arith.constant 0 : index
    %c0_0 = arith.constant 0 : index
    %0 = vector.load %arg1[%c0, %c0_0] : memref<8x256xf32, #tpu.memory_space<vmem>>, vector<8x256xf32>
    %1 = arith.truncf %0 : vector<8x256xf32> to vector<8x256xbf16>
    %c0_1 = arith.constant 0 : index
    %c0_2 = arith.constant 0 : index
    %2 = vector.load %arg3[%c0_1, %c0_2] : memref<256x256xbf16, #tpu.memory_space<vmem>>, vector<256x256xbf16>
    %cst = arith.constant dense<0.000000e+00> : vector<8x256xf32>
    %3 = tpu.matmul %1, %2, %cst {dimension_numbers = #tpu.dot_dimension_numbers<[1], [0], [0], [1], [0, 0, 1, 1], [], []>} : vector<8x256xbf16>, vector<256x256xbf16>, vector<8x256xf32> -> vector<8x256xf32>
    %c0_3 = arith.constant 0 : index
    %c0_4 = arith.constant 0 : index
    %4 = vector.load %arg4[%c0_3, %c0_4] : memref<1x256xf32, #tpu.memory_space<vmem>>, vector<1x256xf32>
    %5 = vector.broadcast %4 : vector<1x256xf32> to vector<8x256xf32>
    %6 = arith.addf %3, %5 : vector<8x256xf32>
    %cst_5 = arith.constant 0.000000e+00 : f32
    %7 = vector.broadcast %cst_5 : f32 to vector<8x256xf32>
    %8 = arith.maximumf %6, %7 : vector<8x256xf32>
    %9 = arith.truncf %8 : vector<8x256xf32> to vector<8x256xbf16>
    %c0_6 = arith.constant 0 : index
    %c0_7 = arith.constant 0 : index
    %10 = vector.load %arg5[%c0_6, %c0_7] : memref<256x256xbf16, #tpu.memory_space<vmem>>, vector<256x256xbf16>
    %cst_8 = arith.constant dense<0.000000e+00> : vector<8x256xf32>
    %11 = tpu.matmul %9, %10, %cst_8 {dimension_numbers = #tpu.dot_dimension_numbers<[1], [0], [0], [1], [0, 0, 1, 1], [], []>} : vector<8x256xbf16>, vector<256x256xbf16>, vector<8x256xf32> -> vector<8x256xf32>
    %c0_9 = arith.constant 0 : index
    %c0_10 = arith.constant 0 : index
    %12 = vector.load %arg6[%c0_9, %c0_10] : memref<1x256xf32, #tpu.memory_space<vmem>>, vector<1x256xf32>
    %13 = vector.broadcast %12 : vector<1x256xf32> to vector<8x256xf32>
    %14 = arith.addf %11, %13 : vector<8x256xf32>
    %15 = vector.extract_strided_slice %14 {offsets = [0, 0], sizes = [8, 128], strides = [1, 1]} : vector<8x256xf32> to vector<8x128xf32>
    %16 = vector.extract_strided_slice %14 {offsets = [0, 128], sizes = [8, 128], strides = [1, 1]} : vector<8x256xf32> to vector<8x128xf32>
    %cst_11 = arith.constant 5.000000e-01 : f32
    %17 = vector.broadcast %cst_11 : f32 to vector<8x128xf32>
    %18 = arith.mulf %17, %16 : vector<8x128xf32>
    %19 = math.exp %18 : vector<8x128xf32>
    %c0_12 = arith.constant 0 : index
    %c0_13 = arith.constant 0 : index
    %20 = vector.load %arg2[%c0_12, %c0_13] : memref<8x128xf32, #tpu.memory_space<vmem>>, vector<8x128xf32>
    %21 = arith.mulf %20, %19 : vector<8x128xf32>
    %22 = arith.addf %15, %21 : vector<8x128xf32>
    %23 = arith.truncf %22 : vector<8x128xf32> to vector<8x128xbf16>
    %c0_14 = arith.constant 0 : index
    %c0_15 = arith.constant 0 : index
    %24 = vector.load %arg7[%c0_14, %c0_15] : memref<128x256xbf16, #tpu.memory_space<vmem>>, vector<128x256xbf16>
    %cst_16 = arith.constant dense<0.000000e+00> : vector<8x256xf32>
    %25 = tpu.matmul %23, %24, %cst_16 {dimension_numbers = #tpu.dot_dimension_numbers<[1], [0], [0], [1], [0, 0, 1, 1], [], []>} : vector<8x128xbf16>, vector<128x256xbf16>, vector<8x256xf32> -> vector<8x256xf32>
    %c0_17 = arith.constant 0 : index
    %c0_18 = arith.constant 0 : index
    %26 = vector.load %arg8[%c0_17, %c0_18] : memref<1x256xf32, #tpu.memory_space<vmem>>, vector<1x256xf32>
    %27 = vector.broadcast %26 : vector<1x256xf32> to vector<8x256xf32>
    %28 = arith.addf %25, %27 : vector<8x256xf32>
    %cst_19 = arith.constant 0.000000e+00 : f32
    %29 = vector.broadcast %cst_19 : f32 to vector<8x256xf32>
    %30 = arith.maximumf %28, %29 : vector<8x256xf32>
    %31 = arith.truncf %30 : vector<8x256xf32> to vector<8x256xbf16>
    %c0_20 = arith.constant 0 : index
    %c0_21 = arith.constant 0 : index
    %32 = vector.load %arg9[%c0_20, %c0_21] : memref<256x256xbf16, #tpu.memory_space<vmem>>, vector<256x256xbf16>
    %cst_22 = arith.constant dense<0.000000e+00> : vector<8x256xf32>
    %33 = tpu.matmul %31, %32, %cst_22 {dimension_numbers = #tpu.dot_dimension_numbers<[1], [0], [0], [1], [0, 0, 1, 1], [], []>} : vector<8x256xbf16>, vector<256x256xbf16>, vector<8x256xf32> -> vector<8x256xf32>
    %c0_23 = arith.constant 0 : index
    %c0_24 = arith.constant 0 : index
    %34 = vector.load %arg10[%c0_23, %c0_24] : memref<1x256xf32, #tpu.memory_space<vmem>>, vector<1x256xf32>
    %35 = vector.broadcast %34 : vector<1x256xf32> to vector<8x256xf32>
    %36 = arith.addf %33, %35 : vector<8x256xf32>
    %cst_25 = arith.constant dense<0xFF800000> : vector<8xf32>
    %37 = vector.multi_reduction <maximumf>, %36, %cst_25 [1] : vector<8x256xf32> to vector<8xf32>
    %38 = vector.shape_cast %37 : vector<8xf32> to vector<8x1xf32>
    %39 = vector.broadcast %38 : vector<8x1xf32> to vector<8x256xf32>
    %40 = arith.subf %36, %39 : vector<8x256xf32>
    %41 = math.exp %40 : vector<8x256xf32>
    %cst_26 = arith.constant dense<0.000000e+00> : vector<8xf32>
    %42 = vector.multi_reduction <add>, %41, %cst_26 [1] : vector<8x256xf32> to vector<8xf32>
    %43 = vector.shape_cast %42 : vector<8xf32> to vector<8x1xf32>
    %44 = tpu.reciprocal %43 {approx = true} : vector<8x1xf32> -> vector<8x1xf32>
    %45 = vector.broadcast %44 : vector<8x1xf32> to vector<8x256xf32>
    %46 = arith.mulf %41, %45 : vector<8x256xf32>
    %c0_27 = arith.constant 0 : index
    %c0_28 = arith.constant 0 : index
    %47 = vector.load %arg11[%c0_27, %c0_28] : memref<8x256xf32, #tpu.memory_space<vmem>>, vector<8x256xf32>
    tpu.vector_store %arg11[%c0_27, %c0_28], %46 {strides = array<i32>} : memref<8x256xf32, #tpu.memory_space<vmem>>, vector<8x256xf32>,
    %c0_29 = arith.constant 0 : index
    %c0_30 = arith.constant 0 : index
    %48 = vector.load %arg12[%c0_29, %c0_30] : memref<8x128xf32, #tpu.memory_space<vmem>>, vector<8x128xf32>
    tpu.vector_store %arg12[%c0_29, %c0_30], %15 {strides = array<i32>} : memref<8x128xf32, #tpu.memory_space<vmem>>, vector<8x128xf32>,
    %c0_31 = arith.constant 0 : index
    %c0_32 = arith.constant 0 : index
    %49 = vector.load %arg13[%c0_31, %c0_32] : memref<8x128xf32, #tpu.memory_space<vmem>>, vector<8x128xf32>
    tpu.vector_store %arg13[%c0_31, %c0_32], %16 {strides = array<i32>} : memref<8x128xf32, #tpu.memory_space<vmem>>, vector<8x128xf32>,
    return
  }
  func.func @transform_0(%arg0: i32) -> (i32, i32) {
    %c0_i32 = arith.constant 0 : i32
    %c0_i32_0 = arith.constant 0 : i32
    return %arg0, %c0_i32 : i32, i32
  }
  func.func @transform_1(%arg0: i32) -> (i32, i32) {
    %c0_i32 = arith.constant 0 : i32
    %c0_i32_0 = arith.constant 0 : i32
    return %arg0, %c0_i32 : i32, i32
  }
  func.func @transform_2(%arg0: i32) -> (i32, i32) {
    %c0_i32 = arith.constant 0 : i32
    %c0_i32_0 = arith.constant 0 : i32
    %c0_i32_1 = arith.constant 0 : i32
    return %c0_i32, %c0_i32_0 : i32, i32
  }
  func.func @transform_3(%arg0: i32) -> (i32, i32) {
    %c0_i32 = arith.constant 0 : i32
    %c0_i32_0 = arith.constant 0 : i32
    %c0_i32_1 = arith.constant 0 : i32
    return %c0_i32, %c0_i32_0 : i32, i32
  }
  func.func @transform_4(%arg0: i32) -> (i32, i32) {
    %c0_i32 = arith.constant 0 : i32
    %c0_i32_0 = arith.constant 0 : i32
    %c0_i32_1 = arith.constant 0 : i32
    return %c0_i32, %c0_i32_0 : i32, i32
  }
  func.func @transform_5(%arg0: i32) -> (i32, i32) {
    %c0_i32 = arith.constant 0 : i32
    %c0_i32_0 = arith.constant 0 : i32
    %c0_i32_1 = arith.constant 0 : i32
    return %c0_i32, %c0_i32_0 : i32, i32
  }
  func.func @transform_6(%arg0: i32) -> (i32, i32) {
    %c0_i32 = arith.constant 0 : i32
    %c0_i32_0 = arith.constant 0 : i32
    %c0_i32_1 = arith.constant 0 : i32
    return %c0_i32, %c0_i32_0 : i32, i32
  }
  func.func @transform_7(%arg0: i32) -> (i32, i32) {
    %c0_i32 = arith.constant 0 : i32
    %c0_i32_0 = arith.constant 0 : i32
    %c0_i32_1 = arith.constant 0 : i32
    return %c0_i32, %c0_i32_0 : i32, i32
  }
  func.func @transform_8(%arg0: i32) -> (i32, i32) {
    %c0_i32 = arith.constant 0 : i32
    %c0_i32_0 = arith.constant 0 : i32
    %c0_i32_1 = arith.constant 0 : i32
    return %c0_i32, %c0_i32_0 : i32, i32
  }
  func.func @transform_9(%arg0: i32) -> (i32, i32) {
    %c0_i32 = arith.constant 0 : i32
    %c0_i32_0 = arith.constant 0 : i32
    %c0_i32_1 = arith.constant 0 : i32
    return %c0_i32, %c0_i32_0 : i32, i32
  }
  func.func @transform_10(%arg0: i32) -> (i32, i32) {
    %c0_i32 = arith.constant 0 : i32
    %c0_i32_0 = arith.constant 0 : i32
    return %arg0, %c0_i32 : i32, i32
  }
  func.func @transform_11(%arg0: i32) -> (i32, i32) {
    %c0_i32 = arith.constant 0 : i32
    %c0_i32_0 = arith.constant 0 : i32
    return %arg0, %c0_i32 : i32, i32
  }
  func.func @transform_12(%arg0: i32) -> (i32, i32) {
    %c0_i32 = arith.constant 0 : i32
    %c0_i32_0 = arith.constant 0 : i32
    return %arg0, %c0_i32 : i32, i32
  }
}

</mosaic_0001>

<bundles_post_ra>
// kernel: tpu_custom_call.1
= control target key start
LH: loop header
LB: loop body
LE: loop exit
PB: predicated region body
PF: predicated region fallthrough
CT: control target
= control target key end

     0   :  { %18 = vsyncpa [#allocation3], 0  ;;  %s1817_s0 = inlined_call_operand.hbm [shape: f32[8,256], index: 0, kind: input, shape index: {}]   ;;  %s1818_s1 = inlined_call_operand.hbm [shape: f32[8,128], index: 1, kind: input, shape index: {}]   ;;  %s1819_s2 = inlined_call_operand.hbm [shape: bf16[256,256], index: 2, kind: input, shape index: {}]   ;;  %s1820_s3 = inlined_call_operand.vmem [shape: f32[1,256], index: 3, kind: input, shape index: {}]   ;;  %s1821_s4 = inlined_call_operand.hbm [shape: bf16[256,256], index: 4, kind: input, shape index: {}]   ;;  %s1822_s5 = inlined_call_operand.vmem [shape: f32[1,256], index: 5, kind: input, shape index: {}]   ;;  %s1823_s6 = inlined_call_operand.hbm [shape: bf16[128,256], index: 6, kind: input, shape index: {}]   ;;  %s1824_s7 = inlined_call_operand.vmem [shape: f32[1,256], index: 7, kind: input, shape index: {}]   ;;  %s1825_s8 = inlined_call_operand.hbm [shape: bf16[256,256], index: 8, kind: input, shape index: {}]   ;;  %s1826_s9 = inlined_call_operand.vmem [shape: f32[1,256], index: 9, kind: input, shape index: {}]   ;;  %s1827_s10 = inlined_call_operand.hbm [shape: f32[8,256], index: 10, kind: output, shape index: {0}]   ;;  %s1828_s11 = inlined_call_operand.hbm [shape: f32[8,128], index: 11, kind: output, shape index: {1}]   ;;  %s1829_s12 = inlined_call_operand.hbm [shape: f32[8,128], index: 12, kind: output, shape index: {2}]  }
   0x1   :  { %19 = vsyncpa [#allocation6], 0 }
   0x2   :  { %20 = vsyncpa [#allocation9], 0 }
   0x3   :  { %21 = vsyncpa [#allocation12], 0 }
   0x4   :  { %22 = vsyncpa [#allocation4], 0 }
   0x5   :  { %23 = vsyncpa [#allocation15], 0  ;;  %s1596_s21 = smov [#allocation5]   ;;  %s1386_s25 = scalar_lea.hbm %s1818_s1, 128 }
   0x6   :  { %s40_s22 = sshll.u32 %s1596_s21, 4  ;;  %p1387_p0 = scmp.ne.s32.totalorder %s1818_s1, %s1386_s25  ;;  %s41_s22 = int_to_ptr.vmem [resolvable:$true] %s40_s22 }
   0x7   :  { %p1390_p1 = scmp.lt.u32.totalorder %s1386_s25, %s1818_s1 }
   0x9   :  { %p1392_p2 = pnand %p1390_p1, %p1387_p0 }
   0xb   :  { %1395 = shalt.err (!%p1392_p2)
}
   0xc   :  { %s1396_s30 = scalar_lea.vmem %s41_s22, 128  ;;  %p1401_p4 = scmp.lt.s32.totalorder %s41_s22, %s41_s22 }
   0xd   :  { %p1397_p3 = scmp.ne.s32.totalorder %s41_s22, %s1396_s30  ;;  %p1402_p5 = scmp.lt.s32.totalorder %s1396_s30, %s1396_s30 }
   0xf   :  { %p1403_p6 = por %p1402_p5, %p1401_p4 }
  0x11   :  { %p1404_p7 = pnand %p1403_p6, %p1397_p3 }
  0x13   :  { %1407 = shalt.err (!%p1404_p7)
}
  0x14   :  { %43 = dma.hbm_to_vmem [thread:$0]  %s1818_s1, 128, %s41_s22, [#allocation6]  }
  0x15   :  { %s1597_s15 = smov [#allocation8]   ;;  %s1598_s17 = smov [#allocation2]  }
  0x16   :  { %s63_s16 = sshll.u32 %s1597_s15, 4  ;;  %s30_s18 = sshll.u32 %s1598_s17, 4  ;;  %s64_s16 = int_to_ptr.vmem [resolvable:$true] %s63_s16  ;;  %s31_s18 = int_to_ptr.vmem [resolvable:$true] %s30_s18 }
  0x17   :  { %s1408_s21 = scalar_lea.hbm %s1821_s4, 4096 }
  0x18   :  { %p1409_p8 = scmp.ne.s32.totalorder %s1821_s4, %s1408_s21  ;;  %p1412_p9 = scmp.lt.u32.totalorder %s1408_s21, %s1821_s4 }
  0x1a   :  { %p1414_p10 = pnand %p1412_p9, %p1409_p8 }
  0x1c   :  { %1417 = shalt.err (!%p1414_p10)
}
  0x1d   :  { %s1418_s1 = scalar_lea.vmem %s64_s16, 4096  ;;  %p1423_p12 = scmp.lt.s32.totalorder %s64_s16, %s64_s16 }
  0x1e   :  { %p1419_p11 = scmp.ne.s32.totalorder %s64_s16, %s1418_s1  ;;  %p1424_p13 = scmp.lt.s32.totalorder %s1418_s1, %s1418_s1 }
  0x20   :  { %p1425_p0 = por %p1424_p13, %p1423_p12 }
  0x22   :  { %p1426_p1 = pnand %p1425_p0, %p1419_p11 }
  0x24   :  { %1429 = shalt.err (!%p1426_p1)
}
  0x25   :  { %s1599_s22 = smov 128   ;;  %s1600_s27 = smov 8  }
  0x26   :  { %69 = dma.hbm_to_vmem [thread:$0]  %s1821_s4, 4096, %s64_s16, [#allocation9], %s1599_s22, %s1599_s22, %s1600_s27  }
  0x27   :  { %s1430_s14 = scalar_lea.hbm %s1817_s0, 256 }
  0x28   :  { %p1431_p2 = scmp.ne.s32.totalorder %s1817_s0, %s1430_s14  ;;  %p1434_p3 = scmp.lt.u32.totalorder %s1430_s14, %s1817_s0 }
  0x2a   :  { %p1436_p4 = pnand %p1434_p3, %p1431_p2 }
  0x2c   :  { %1439 = shalt.err (!%p1436_p4)
}
  0x2d   :  { %s1440_s21 = scalar_lea.vmem %s31_s18, 256  ;;  %p1445_p6 = scmp.lt.s32.totalorder %s31_s18, %s31_s18 }
  0x2e   :  { %p1441_p5 = scmp.ne.s32.totalorder %s31_s18, %s1440_s21  ;;  %p1446_p7 = scmp.lt.s32.totalorder %s1440_s21, %s1440_s21 }
  0x30   :  { %p1447_p8 = por %p1446_p7, %p1445_p6 }
  0x32   :  { %p1448_p9 = pnand %p1447_p8, %p1441_p5 }
  0x34   :  { %1451 = shalt.err (!%p1448_p9)
}
  0x35   :  { %33 = dma.hbm_to_vmem [thread:$0]  %s1817_s0, 256, %s31_s18, [#allocation3]  }
  0x36   :  { %s1601_s23 = smov [#allocation7]   ;;  %s1602_s25 = smov [#allocation10]  }
  0x37   :  { %s49_s24 = sshll.u32 %s1601_s23, 4  ;;  %s77_s26 = sshll.u32 %s1602_s25, 4  ;;  %s50_s24 = int_to_ptr.vmem [resolvable:$true] %s49_s24  ;;  %s78_s26 = int_to_ptr.vmem [resolvable:$true] %s77_s26 }
  0x38   :  { %s1452_s29 = scalar_lea.hbm %s1819_s2, 4096 }
  0x39   :  { %p1453_p10 = scmp.ne.s32.totalorder %s1819_s2, %s1452_s29  ;;  %p1456_p11 = scmp.lt.u32.totalorder %s1452_s29, %s1819_s2 }
  0x3b   :  { %p1458_p12 = pnand %p1456_p11, %p1453_p10 }
  0x3d   :  { %1461 = shalt.err (!%p1458_p12)
}
  0x3e   :  { %s1462_s0 = scalar_lea.vmem %s50_s24, 4096  ;;  %p1467_p0 = scmp.lt.s32.totalorder %s50_s24, %s50_s24 }
  0x3f   :  { %p1463_p13 = scmp.ne.s32.totalorder %s50_s24, %s1462_s0  ;;  %p1468_p1 = scmp.lt.s32.totalorder %s1462_s0, %s1462_s0 }
  0x41   :  { %p1469_p2 = por %p1468_p1, %p1467_p0 }
  0x43   :  { %p1470_p3 = pnand %p1469_p2, %p1463_p13 }
  0x45   :  { %1473 = shalt.err (!%p1470_p3)
}
  0x46   :  { %55 = dma.hbm_to_vmem [thread:$0]  %s1819_s2, 4096, %s50_s24, [#allocation6], %s1599_s22, %s1599_s22, %s1600_s27  }
  0x47   :  { %s1474_s21 = scalar_lea.hbm %s1823_s6, 2048 }
  0x48   :  { %p1475_p4 = scmp.ne.s32.totalorder %s1823_s6, %s1474_s21  ;;  %p1478_p5 = scmp.lt.u32.totalorder %s1474_s21, %s1823_s6 }
  0x4a   :  { %p1480_p6 = pnand %p1478_p5, %p1475_p4 }
  0x4c   :  { %1483 = shalt.err (!%p1480_p6)
}
  0x4d   :  { %s1484_s1 = scalar_lea.vmem %s78_s26, 2048  ;;  %p1489_p8 = scmp.lt.s32.totalorder %s78_s26, %s78_s26 }
  0x4e   :  { %p1485_p7 = scmp.ne.s32.totalorder %s78_s26, %s1484_s1  ;;  %p1490_p9 = scmp.lt.s32.totalorder %s1484_s1, %s1484_s1 }
  0x50   :  { %p1491_p10 = por %p1490_p9, %p1489_p8 }
  0x52   :  { %p1492_p11 = pnand %p1491_p10, %p1485_p7 }
  0x54   :  { %1495 = shalt.err (!%p1492_p11)
}
  0x55   :  { %83 = dma.hbm_to_vmem [thread:$0]  %s1823_s6, 2048, %s78_s26, [#allocation9], %s1599_s22, %s1599_s22, %s1600_s27  }
  0x56   :  { %s1603_s28 = smov [#allocation11]   ;;  %s1496_s14 = scalar_lea.hbm %s1825_s8, 4096 }
  0x57   :  { %s91_s29 = sshll.u32 %s1603_s28, 4  ;;  %p1497_p12 = scmp.ne.s32.totalorder %s1825_s8, %s1496_s14  ;;  %s92_s29 = int_to_ptr.vmem [resolvable:$true] %s91_s29 }
  0x58   :  { %p1500_p13 = scmp.lt.u32.totalorder %s1496_s14, %s1825_s8 }
  0x5a   :  { %p1502_p0 = pnand %p1500_p13, %p1497_p12 }
  0x5c   :  { %1505 = shalt.err (!%p1502_p0)
}
  0x5d   :  { %s1506_s19 = scalar_lea.vmem %s92_s29, 4096  ;;  %p1511_p2 = scmp.lt.s32.totalorder %s92_s29, %s92_s29 }
  0x5e   :  { %p1507_p1 = scmp.ne.s32.totalorder %s92_s29, %s1506_s19  ;;  %p1512_p3 = scmp.lt.s32.totalorder %s1506_s19, %s1506_s19 }
  0x60   :  { %p1513_p4 = por %p1512_p3, %p1511_p2 }
  0x62   :  { %p1514_p5 = pnand %p1513_p4, %p1507_p1 }
  0x64   :  { %1517 = shalt.err (!%p1514_p5)
}
  0x65   :  { %97 = dma.hbm_to_vmem [thread:$0]  %s1825_s8, 4096, %s92_s29, [#allocation12], %s1599_s22, %s1599_s22, %s1600_s27  }
  0x66   :  { %1584 = dma.done.wait [#allocation3], 256  }
  0x67   :  { %1585 = vsyncadd [#allocation3], 4294967040 }
  0x68   :  { %1586 = dma.done.wait [#allocation6], 4224  }
  0x69   :  { %1587 = vsyncadd [#allocation6], 4294963072 }
  0x6a   :  { %1588 = dma.done.wait [#allocation9], 6144  }
  0x6b   :  { %1589 = vsyncadd [#allocation9], 4294961152 }
  0x6c   :  { %1590 = dma.done.wait [#allocation12], 4096  }
  0x6d   :  { %1591 = vsyncadd [#allocation12], 4294963200  ;;  %v1210_v0 = vld [vmem:[#allocation7 + $0x4] ss:$8 sps:$4 sm:$0xff]   ;;  %v1212_v1 = vld [vmem:[#allocation7] ss:$8 sps:$4 sm:$0xff]  }
  0x6e   :  { %327 = vmatprep.subr.bf16.mxu0 %v1210_v0  ;;  %v1213_v2 = vld [vmem:[#allocation7 + $0x14] ss:$8 sps:$4 sm:$0xff]   ;;  %v1215_v3 = vld [vmem:[#allocation7 + $0x10] ss:$8 sps:$4 sm:$0xff]   ;;  %v1216_v4 = vld [vmem:[#allocation7 + $0x24] ss:$8 sps:$4 sm:$0xff]  }
  0x6f   :  { %328 = vmatpush1.bf16.msra.mxu0 %v1212_v1  ;;  %v1218_v5 = vld [vmem:[#allocation7 + $0x20] ss:$8 sps:$4 sm:$0xff]   ;;  %v1219_v6 = vld [vmem:[#allocation7 + $0x34] ss:$8 sps:$4 sm:$0xff]   ;;  %v1221_v7 = vld [vmem:[#allocation7 + $0x30] ss:$8 sps:$4 sm:$0xff]  }
  0x70   :  { %329 = vmatprep.subr.bf16.mxu0 %v1213_v2  ;;  %v1222_v8 = vld [vmem:[#allocation7 + $0x44] ss:$8 sps:$4 sm:$0xff]   ;;  %v1224_v9 = vld [vmem:[#allocation7 + $0x40] ss:$8 sps:$4 sm:$0xff]   ;;  %v1225_v10 = vld [vmem:[#allocation7 + $0x54] ss:$8 sps:$4 sm:$0xff]  }
  0x71   :  { %v1227_v11 = vld [vmem:[#allocation7 + $0x50] ss:$8 sps:$4 sm:$0xff]   ;;  %v1228_v12 = vld [vmem:[#allocation7 + $0x64] ss:$8 sps:$4 sm:$0xff]   ;;  %v1230_v13 = vld [vmem:[#allocation7 + $0x60] ss:$8 sps:$4 sm:$0xff]  }
  0x72   :  { %v120_v14 = vld [vmem:[#allocation2 + $0x8] sm:$0xff]  ;;  %v1258_v16 = vld [vmem:[#allocation8 + $0x4] ss:$8 sps:$4 sm:$0xff]   ;;  %v1260_v17 = vld [vmem:[#allocation8] ss:$8 sps:$4 sm:$0xff]  }
  0x73   :  { %330 = vmatpush1.bf16.msra.mxu0 %v1215_v3  ;;  %v122_v15 = vpack.c.bf16 %v120_v14, %v120_v14  ;;  %v1231_v18 = vld [vmem:[#allocation7 + $0x74] ss:$8 sps:$4 sm:$0xff]   ;;  %v1233_v20 = vld [vmem:[#allocation7 + $0x70] ss:$8 sps:$4 sm:$0xff]   ;;  %576 = vmatprep.subr.bf16.mxu1 %v1258_v16  ;;  %v1264_v22 = vld [vmem:[#allocation8 + $0x24] ss:$8 sps:$4 sm:$0xff]  }
  0x74   :  { %331 = vmatprep.subr.bf16.mxu0 %v1216_v4  ;;  %v1261_v19 = vld [vmem:[#allocation8 + $0x14] ss:$8 sps:$4 sm:$0xff]   ;;  %577 = vmatpush1.bf16.msra.mxu1 %v1260_v17  ;;  %v1263_v21 = vld [vmem:[#allocation8 + $0x10] ss:$8 sps:$4 sm:$0xff]   ;;  %v1234_v23 = vld [vmem:[#allocation7 + $0x84] ss:$8 sps:$4 sm:$0xff]  }
  0x75   :  { %359 = vmatprep.mubr.bf16.mxu0 %v122_v15  ;;  %578 = vmatprep.subr.bf16.mxu1 %v1261_v19  ;;  %v1236_v24 = vld [vmem:[#allocation7 + $0x80] ss:$8 sps:$4 sm:$0xff]   ;;  %v1267_v26 = vld [vmem:[#allocation8 + $0x34] ss:$8 sps:$4 sm:$0xff]   ;;  %v1239_v28 = vld [vmem:[#allocation7 + $0x90] ss:$8 sps:$4 sm:$0xff]  }
  0x76   :  { %v1266_v25 = vld [vmem:[#allocation8 + $0x20] ss:$8 sps:$4 sm:$0xff]   ;;  %v1237_v27 = vld [vmem:[#allocation7 + $0x94] ss:$8 sps:$4 sm:$0xff]   ;;  %v1269_v29 = vld [vmem:[#allocation8 + $0x30] ss:$8 sps:$4 sm:$0xff]  }
  0x77   :  { %332 = vmatpush1.bf16.msra.mxu0 %v1218_v5  ;;  %v1270_v30 = vld [vmem:[#allocation8 + $0x44] ss:$8 sps:$4 sm:$0xff]   ;;  %v1242_v32 = vld [vmem:[#allocation7 + $0xa0] ss:$8 sps:$4 sm:$0xff]   ;;  %v1273_v34 = vld [vmem:[#allocation8 + $0x54] ss:$8 sps:$4 sm:$0xff]  }
  0x78   :  { %333 = vmatprep.subr.bf16.mxu0 %v1219_v6  ;;  %579 = vmatpush1.bf16.msra.mxu1 %v1263_v21  ;;  %v1240_v31 = vld [vmem:[#allocation7 + $0xa4] ss:$8 sps:$4 sm:$0xff]   ;;  %v1272_v33 = vld [vmem:[#allocation8 + $0x40] ss:$8 sps:$4 sm:$0xff]   ;;  %v1243_v35 = vld [vmem:[#allocation7 + $0xb4] ss:$8 sps:$4 sm:$0xff]  }
  0x79   :  { %580 = vmatprep.subr.bf16.mxu1 %v1264_v22  ;;  %v1275_v36 = vld [vmem:[#allocation8 + $0x50] ss:$8 sps:$4 sm:$0xff]   ;;  %v1276_v38 = vld [vmem:[#allocation8 + $0x64] ss:$8 sps:$4 sm:$0xff]   ;;  %v1278_v40 = vld [vmem:[#allocation8 + $0x60] ss:$8 sps:$4 sm:$0xff]  }
  0x7a   :  { %v1245_v37 = vld [vmem:[#allocation7 + $0xb0] ss:$8 sps:$4 sm:$0xff]   ;;  %v1246_v39 = vld [vmem:[#allocation7 + $0xc4] ss:$8 sps:$4 sm:$0xff]   ;;  %v1248_v41 = vld [vmem:[#allocation7 + $0xc0] ss:$8 sps:$4 sm:$0xff]  }
  0x7b   :  { %334 = vmatpush1.bf16.msra.mxu0 %v1221_v7  ;;  %v1279_v42 = vld [vmem:[#allocation8 + $0x74] ss:$8 sps:$4 sm:$0xff]   ;;  %v1281_v44 = vld [vmem:[#allocation8 + $0x70] ss:$8 sps:$4 sm:$0xff]   ;;  %v1282_v46 = vld [vmem:[#allocation8 + $0x84] ss:$8 sps:$4 sm:$0xff]  }
  0x7c   :  { %335 = vmatprep.subr.bf16.mxu0 %v1222_v8  ;;  %581 = vmatpush1.bf16.msra.mxu1 %v1266_v25  ;;  %v1249_v43 = vld [vmem:[#allocation7 + $0xd4] ss:$8 sps:$4 sm:$0xff]   ;;  %v1251_v45 = vld [vmem:[#allocation7 + $0xd0] ss:$8 sps:$4 sm:$0xff]   ;;  %v1252_v47 = vld [vmem:[#allocation7 + $0xe4] ss:$8 sps:$4 sm:$0xff]   ;;  %v157_v8 = vlaneseq }
  0x7d   :  { %582 = vmatprep.subr.bf16.mxu1 %v1267_v26  ;;  %v1284_v48 = vld [vmem:[#allocation8 + $0x80] ss:$8 sps:$4 sm:$0xff]   ;;  %v1285_v50 = vld [vmem:[#allocation8 + $0x94] ss:$8 sps:$4 sm:$0xff]   ;;  %v1287_v52 = vld [vmem:[#allocation8 + $0x90] ss:$8 sps:$4 sm:$0xff]  }
  0x7e   :  { %v1254_v49 = vld [vmem:[#allocation7 + $0xe0] ss:$8 sps:$4 sm:$0xff]   ;;  %v1255_v51 = vld [vmem:[#allocation7 + $0xf4] ss:$8 sps:$4 sm:$0xff]   ;;  %v1257_v53 = vld [vmem:[#allocation7 + $0xf0] ss:$8 sps:$4 sm:$0xff]  }
  0x7f   :  { %336 = vmatpush1.bf16.msra.mxu0 %v1224_v9  ;;  %v119_v54 = vld [vmem:[#allocation2] sm:$0xff]  ;;  %v1291_v58 = vld [vmem:[#allocation8 + $0xb4] ss:$8 sps:$4 sm:$0xff]   ;;  %v1293_v59 = vld [vmem:[#allocation8 + $0xb0] ss:$8 sps:$4 sm:$0xff]   ;;  %v158_v9 = vshrl.u32 %v157_v8, 7 }
  0x80   :  { %337 = vmatprep.subr.bf16.mxu0 %v1225_v10  ;;  %583 = vmatpush1.bf16.msra.mxu1 %v1269_v29  ;;  %v1288_v55 = vld [vmem:[#allocation8 + $0xa4] ss:$8 sps:$4 sm:$0xff]   ;;  %v121_v56 = vpack.c.bf16 %v119_v54, %v119_v54  ;;  %v1290_v57 = vld [vmem:[#allocation8 + $0xa0] ss:$8 sps:$4 sm:$0xff]   ;;  %v1297_v62 = vld [vmem:[#allocation8 + $0xd4] ss:$8 sps:$4 sm:$0xff]  }
  0x81   :  { %584 = vmatprep.subr.bf16.mxu1 %v1270_v30  ;;  %v1294_v60 = vld [vmem:[#allocation8 + $0xc4] ss:$8 sps:$4 sm:$0xff]   ;;  %v1296_v61 = vld [vmem:[#allocation8 + $0xc0] ss:$8 sps:$4 sm:$0xff]   ;;  %v1299_v63 = vld [vmem:[#allocation8 + $0xd0] ss:$8 sps:$4 sm:$0xff]  }
  0x82   :  { %v1300_v0 = vld [vmem:[#allocation8 + $0xe4] ss:$8 sps:$4 sm:$0xff]   ;;  %v1302_v1 = vld [vmem:[#allocation8 + $0xe0] ss:$8 sps:$4 sm:$0xff]   ;;  %v1303_v2 = vld [vmem:[#allocation8 + $0xf4] ss:$8 sps:$4 sm:$0xff]  }
  0x83   :  { %338 = vmatpush1.bf16.msra.mxu0 %v1227_v11  ;;  %v1305_v3 = vld [vmem:[#allocation8 + $0xf0] ss:$8 sps:$4 sm:$0xff]   ;;  %v1306_v4 = vld [vmem:[#allocation10] ss:$8 sps:$4 sm:$0xff]   ;;  %v1308_v5 = vld [vmem:[#allocation10 + $0x4] ss:$8 sps:$4 sm:$0xff]  }
  0x84   :  { %339 = vmatprep.subr.bf16.mxu0 %v1228_v12  ;;  %585 = vmatpush1.bf16.msra.mxu1 %v1272_v33  ;;  %v1311_v6 = vld [vmem:[#allocation10 + $0x14] ss:$8 sps:$4 sm:$0xff]   ;;  %v1309_v7 = vld [vmem:[#allocation10 + $0x10] ss:$8 sps:$4 sm:$0xff]   ;;  %v1757_v10 = vsub.s32 0, %v158_v9  ;;  %v1762_v12 = vsub.s32 1, %v158_v9 }
  0x85   :  { %586 = vmatprep.subr.bf16.mxu1 %v1273_v34  ;;  %v155_v11 = vld [vmem:[%s1820_s3] sm:$0x3]  ;;  %v1314_v25 = vld [vmem:[#allocation10 + $0x24] ss:$8 sps:$4 sm:$0xff]   ;;  %v1604_v34 = vmov 0  }
  0x86   :  { %v164_v14 = vrot.slane %v155_v11, %v1762_v12  ;;  %v1312_v26 = vld [vmem:[#allocation10 + $0x20] ss:$8 sps:$4 sm:$0xff]   ;;  %v1320_v29 = vld [vmem:[#allocation10 + $0x44] ss:$8 sps:$4 sm:$0xff]  }
  0x87   :  { %340 = vmatpush1.bf16.msra.mxu0 %v1230_v13  ;;  %v160_v13 = vrot.slane %v155_v11, %v1757_v10  ;;  %v1318_v30 = vld [vmem:[#allocation10 + $0x40] ss:$8 sps:$4 sm:$0xff]   ;;  %v1326_v33 = vld [vmem:[#allocation10 + $0x64] ss:$8 sps:$4 sm:$0xff]  }
  0x88   :  { %341 = vmatprep.subr.bf16.mxu0 %v1231_v18  ;;  %587 = vmatpush1.bf16.msra.mxu1 %v1275_v36  ;;  %v1329_v36 = vld [vmem:[#allocation10 + $0x74] ss:$8 sps:$4 sm:$0xff]   ;;  %v1356_v54 = vld [vmem:[#allocation11 + $0x84] ss:$8 sps:$4 sm:$0xff]  }
  0x89   :  { %588 = vmatprep.subr.bf16.mxu1 %v1276_v38  ;;  %v1330_v38 = vld [vmem:[#allocation11] ss:$8 sps:$4 sm:$0xff]  }
  0x8b   :  { %342 = vmatpush1.bf16.msra.mxu0 %v1233_v20 }
  0x8c   :  { %343 = vmatprep.subr.bf16.mxu0 %v1234_v23  ;;  %589 = vmatpush1.bf16.msra.mxu1 %v1278_v40  ;;  %v1335_v40 = vld [vmem:[#allocation11 + $0x14] ss:$8 sps:$4 sm:$0xff]  }
  0x8d   :  { %590 = vmatprep.subr.bf16.mxu1 %v1279_v42  ;;  %v1338_v42 = vld [vmem:[#allocation11 + $0x24] ss:$8 sps:$4 sm:$0xff]  }
  0x8f   :  { %344 = vmatpush1.bf16.msra.mxu0 %v1236_v24 }
  0x90   :  { %345 = vmatprep.subr.bf16.mxu0 %v1237_v27  ;;  %591 = vmatpush1.bf16.msra.mxu1 %v1281_v44  ;;  %v1317_v27 = vld [vmem:[#allocation10 + $0x34] ss:$8 sps:$4 sm:$0xff]  }
  0x91   :  { %592 = vmatprep.subr.bf16.mxu1 %v1282_v46  ;;  %v1341_v44 = vld [vmem:[#allocation11 + $0x34] ss:$8 sps:$4 sm:$0xff]   ;;  %v1344_v46 = vld [vmem:[#allocation11 + $0x44] ss:$8 sps:$4 sm:$0xff]  }
  0x93   :  { %346 = vmatpush1.bf16.msra.mxu0 %v1239_v28  ;;  %v1315_v28 = vld [vmem:[#allocation10 + $0x30] ss:$8 sps:$4 sm:$0xff]  }
  0x94   :  { %347 = vmatprep.subr.bf16.mxu0 %v1240_v31  ;;  %593 = vmatpush1.bf16.msra.mxu1 %v1284_v48  ;;  %v1323_v31 = vld [vmem:[#allocation10 + $0x54] ss:$8 sps:$4 sm:$0xff]  }
  0x95   :  { %594 = vmatprep.subr.bf16.mxu1 %v1285_v50  ;;  %v1347_v48 = vld [vmem:[#allocation11 + $0x54] ss:$8 sps:$4 sm:$0xff]   ;;  %v1350_v50 = vld [vmem:[#allocation11 + $0x64] ss:$8 sps:$4 sm:$0xff]  }
  0x97   :  { %348 = vmatpush1.bf16.msra.mxu0 %v1242_v32  ;;  %v1321_v32 = vld [vmem:[#allocation10 + $0x50] ss:$8 sps:$4 sm:$0xff]  }
  0x98   :  { %349 = vmatprep.subr.bf16.mxu0 %v1243_v35  ;;  %595 = vmatpush1.bf16.msra.mxu1 %v1287_v52  ;;  %v1324_v35 = vld [vmem:[#allocation10 + $0x60] ss:$8 sps:$4 sm:$0xff]   ;;  %v1353_v52 = vld [vmem:[#allocation11 + $0x74] ss:$8 sps:$4 sm:$0xff]  }
  0x99   :  { %596 = vmatprep.subr.bf16.mxu1 %v1288_v55  ;;  %v1354_v55 = vld [vmem:[#allocation11 + $0x80] ss:$8 sps:$4 sm:$0xff]  }
  0x9b   :  { %350 = vmatpush1.bf16.msra.mxu0 %v1245_v37  ;;  %v1327_v37 = vld [vmem:[#allocation10 + $0x70] ss:$8 sps:$4 sm:$0xff]  }
  0x9c   :  { %351 = vmatprep.subr.bf16.mxu0 %v1246_v39  ;;  %597 = vmatpush1.bf16.msra.mxu1 %v1290_v57  ;;  %v1332_v39 = vld [vmem:[#allocation11 + $0x4] ss:$8 sps:$4 sm:$0xff]   ;;  %v1357_v57 = vld [vmem:[#allocation11 + $0x90] ss:$8 sps:$4 sm:$0xff]  }
  0x9d   :  { %598 = vmatprep.subr.bf16.mxu1 %v1291_v58  ;;  %v1362_v58 = vld [vmem:[#allocation11 + $0xa4] ss:$8 sps:$4 sm:$0xff]  }
  0x9f   :  { %352 = vmatpush1.bf16.msra.mxu0 %v1248_v41  ;;  %v1333_v41 = vld [vmem:[#allocation11 + $0x10] ss:$8 sps:$4 sm:$0xff]  }
  0xa0   :  { %353 = vmatprep.subr.bf16.mxu0 %v1249_v43  ;;  %599 = vmatpush1.bf16.msra.mxu1 %v1293_v59  ;;  %v1336_v43 = vld [vmem:[#allocation11 + $0x20] ss:$8 sps:$4 sm:$0xff]  }
  0xa1   :  { %600 = vmatprep.subr.bf16.mxu1 %v1294_v60  ;;  %v1360_v59 = vld [vmem:[#allocation11 + $0xa0] ss:$8 sps:$4 sm:$0xff]   ;;  %v1365_v60 = vld [vmem:[#allocation11 + $0xb4] ss:$8 sps:$4 sm:$0xff]  }
  0xa3   :  { %354 = vmatpush1.bf16.msra.mxu0 %v1251_v45  ;;  %v1339_v45 = vld [vmem:[#allocation11 + $0x30] ss:$8 sps:$4 sm:$0xff]  }
  0xa4   :  { %355 = vmatprep.subr.bf16.mxu0 %v1252_v47  ;;  %601 = vmatpush1.bf16.msra.mxu1 %v1296_v61  ;;  %v1342_v47 = vld [vmem:[#allocation11 + $0x40] ss:$8 sps:$4 sm:$0xff]   ;;  %v1363_v61 = vld [vmem:[#allocation11 + $0xb0] ss:$8 sps:$4 sm:$0xff]  }
  0xa5   :  { %602 = vmatprep.subr.bf16.mxu1 %v1297_v62  ;;  %v1368_v62 = vld [vmem:[#allocation11 + $0xc4] ss:$8 sps:$4 sm:$0xff]  }
  0xa7   :  { %356 = vmatpush1.bf16.msra.mxu0 %v1254_v49  ;;  %v1345_v49 = vld [vmem:[#allocation11 + $0x50] ss:$8 sps:$4 sm:$0xff]  }
  0xa8   :  { %357 = vmatprep.subr.bf16.mxu0 %v1255_v51  ;;  %603 = vmatpush1.bf16.msra.mxu1 %v1299_v63  ;;  %v1348_v51 = vld [vmem:[#allocation11 + $0x60] ss:$8 sps:$4 sm:$0xff]  }
  0xa9   :  { %604 = vmatprep.subr.bf16.mxu1 %v1300_v0  ;;  %v1366_v63 = vld [vmem:[#allocation11 + $0xc0] ss:$8 sps:$4 sm:$0xff]   ;;  %v1371_v0 = vld [vmem:[#allocation11 + $0xd4] ss:$8 sps:$4 sm:$0xff]  }
  0xab   :  { %358 = vmatpush1.bf16.msra.mxu0 %v1257_v53  ;;  %v1351_v53 = vld [vmem:[#allocation11 + $0x70] ss:$8 sps:$4 sm:$0xff]  }
  0xac   :  { %605 = vmatpush1.bf16.msra.mxu1 %v1302_v1  ;;  %732 = vmatprep.subr.bf16.mxu0 %v1308_v5  ;;  %v1369_v1 = vld [vmem:[#allocation11 + $0xd0] ss:$8 sps:$4 sm:$0xff]  }
  0xad   :  { %606 = vmatprep.subr.bf16.mxu1 %v1303_v2  ;;  %v404_v2 = vld [vmem:[%s1822_s5] sm:$0x3] }
  0xae   :  { %360 = vmatmul.mubr.bf16.vlgmr.msra.gmra.mrb[0].mxu0 %v121_v56  ;;  %v1359_v56 = vld [vmem:[#allocation11 + $0x94] ss:$8 sps:$4 sm:$0xff]  }
  0xaf   :  { %733 = vmatpush1.bf16.msra.mxu0 %v1306_v4  ;;  %764 = vmatprep.mubr.bf16.mxu0 %v1604_v34  ;;  %v413_v4 = vrot.slane %v404_v2, %v1762_v12 }
  0xb0   :  { %607 = vmatpush1.bf16.msra.mxu1 %v1305_v3  ;;  %734 = vmatprep.subr.bf16.mxu0 %v1311_v6  ;;  %v409_v3 = vrot.slane %v404_v2, %v1757_v10 }
  0xb1   :  { %981 = vmatprep.subr.bf16.mxu1 %v1332_v39 }
  0xb3   :  { %735 = vmatpush1.bf16.msra.mxu0 %v1309_v7 }
  0xb4   :  { %736 = vmatprep.subr.bf16.mxu0 %v1314_v25 }
  0xb7   :  { %737 = vmatpush1.bf16.msra.mxu0 %v1312_v26 }
  0xb8   :  { %738 = vmatprep.subr.bf16.mxu0 %v1317_v27 }
  0xbb   :  { %739 = vmatpush1.bf16.msra.mxu0 %v1315_v28 }
  0xbc   :  { %740 = vmatprep.subr.bf16.mxu0 %v1320_v29 }
  0xbf   :  { %741 = vmatpush1.bf16.msra.mxu0 %v1318_v30 }
  0xc0   :  { %742 = vmatprep.subr.bf16.mxu0 %v1323_v31 }
  0xc3   :  { %743 = vmatpush1.bf16.msra.mxu0 %v1321_v32 }
  0xc4   :  { %744 = vmatprep.subr.bf16.mxu0 %v1326_v33 }
  0xc7   :  { %745 = vmatpush1.bf16.msra.mxu0 %v1324_v35 }
  0xc8   :  { %746 = vmatprep.subr.bf16.mxu0 %v1329_v36 }
  0xcb   :  { %747 = vmatpush1.bf16.msra.mxu0 %v1327_v37  ;;  %v809_v37 = vld [vmem:[%s1826_s9] sm:$0x3] }
  0xcc   :  { %v818_v39 = vrot.slane %v809_v37, %v1762_v12 }
 0x181   :  { %v361_v15 = vpop.f32.mrb[0].mxu0 }
 0x182   :  { %v362_v16 = vadd.f32 %v361_v15, %v160_v13  ;;  %v363_v17 = vpop.f32.mrb[1].mxu0  ;;  %v620_v15 = vld [vmem:[#allocation5] sm:$0xff] }
 0x183   :  { %v364_v18 = vadd.f32 %v363_v17, %v164_v14  ;;  %v365_v19 = vpop.f32.mrb[2].mxu0 }
 0x184   :  { %v368_v20 = vmax.f32 %v362_v16, 0.0  ;;  %v366_v21 = vpop.f32.mrb[3].mxu0 }
 0x185   :  { %v369_v22 = vmax.f32 %v364_v18, 0.0  ;;  %v1372_v21 = vld [vmem:[#allocation11 + $0xe0] ss:$8 sps:$4 sm:$0xff]  }
 0x186   :  { %v370_v24 = vpack.c.bf16 %v368_v20, %v368_v20  ;;  %v1374_v20 = vld [vmem:[#allocation11 + $0xe4] ss:$8 sps:$4 sm:$0xff]  }
 0x187   :  { %v371_v23 = vpack.c.bf16 %v369_v22, %v369_v22  ;;  %v1377_v22 = vld [vmem:[#allocation11 + $0xf4] ss:$8 sps:$4 sm:$0xff]  }
 0x189   :  { %608 = vmatprep.mubr.bf16.mxu1 %v371_v23  ;;  %v1375_v23 = vld [vmem:[#allocation11 + $0xf0] ss:$8 sps:$4 sm:$0xff]  }
 0x18a   :  { %609 = vmatmul.mubr.bf16.vlgmr.msra.gmra.mrb[0].mxu1 %v370_v24  ;;  %v640_v24 = vld [vmem:[%s1824_s7] sm:$0x3]  ;;  %s1605_s7 = smov [#allocation14]  }
 0x18b   :  { %982 = vmatpush1.bf16.msra.mxu1 %v1330_v38  ;;  %v645_v25 = vrot.slane %v640_v24, %v1757_v10  ;;  %v649_v26 = vrot.slane %v640_v24, %v1762_v12  ;;  %v814_v38 = vrot.slane %v809_v37, %v1757_v10  ;;  %s1057_s9 = sshll.u32 %s1605_s7, 4  ;;  %s1058_s9 = int_to_ptr.vmem [resolvable:$true] %s1057_s9 }
 0x18c   :  { %983 = vmatprep.subr.bf16.mxu1 %v1335_v40  ;;  %s1518_s16 = scalar_lea.vmem %s1058_s9, 128  ;;  %p1523_p7 = scmp.lt.s32.totalorder %s1058_s9, %s1058_s9 }
 0x18d   :  { %p1519_p6 = scmp.ne.s32.totalorder %s1058_s9, %s1518_s16  ;;  %p1524_p8 = scmp.lt.s32.totalorder %s1518_s16, %s1518_s16 }
 0x18f   :  { %984 = vmatpush1.bf16.msra.mxu1 %v1333_v41  ;;  %p1525_p9 = por %p1524_p8, %p1523_p7 }
 0x190   :  { %985 = vmatprep.subr.bf16.mxu1 %v1338_v42 }
 0x191   :  { %p1526_p10 = pnand %p1525_p9, %p1519_p6 }
 0x193   :  { %986 = vmatpush1.bf16.msra.mxu1 %v1336_v43 }
 0x194   :  { %987 = vmatprep.subr.bf16.mxu1 %v1341_v44 }
 0x197   :  { %988 = vmatpush1.bf16.msra.mxu1 %v1339_v45 }
 0x198   :  { %989 = vmatprep.subr.bf16.mxu1 %v1344_v46 }
 0x19b   :  { %990 = vmatpush1.bf16.msra.mxu1 %v1342_v47 }
 0x19c   :  { %991 = vmatprep.subr.bf16.mxu1 %v1347_v48 }
 0x19f   :  { %992 = vmatpush1.bf16.msra.mxu1 %v1345_v49 }
 0x1a0   :  { %993 = vmatprep.subr.bf16.mxu1 %v1350_v50 }
 0x1a3   :  { %994 = vmatpush1.bf16.msra.mxu1 %v1348_v51 }
 0x1a4   :  { %995 = vmatprep.subr.bf16.mxu1 %v1353_v52 }
 0x1a7   :  { %996 = vmatpush1.bf16.msra.mxu1 %v1351_v53 }
 0x1a8   :  { %997 = vmatprep.subr.bf16.mxu1 %v1356_v54 }
 0x1ab   :  { %998 = vmatpush1.bf16.msra.mxu1 %v1354_v55 }
 0x1ac   :  { %999 = vmatprep.subr.bf16.mxu1 %v1359_v56 }
 0x1af   :  { %1000 = vmatpush1.bf16.msra.mxu1 %v1357_v57 }
 0x1b0   :  { %1001 = vmatprep.subr.bf16.mxu1 %v1362_v58 }
 0x1b3   :  { %1002 = vmatpush1.bf16.msra.mxu1 %v1360_v59 }
 0x1b4   :  { %1003 = vmatprep.subr.bf16.mxu1 %v1365_v60 }
 0x1b7   :  { %1004 = vmatpush1.bf16.msra.mxu1 %v1363_v61 }
 0x1b8   :  { %1005 = vmatprep.subr.bf16.mxu1 %v1368_v62 }
 0x1bb   :  { %1006 = vmatpush1.bf16.msra.mxu1 %v1366_v63 }
 0x1bc   :  { %1007 = vmatprep.subr.bf16.mxu1 %v1371_v0 }
 0x1bf   :  { %1008 = vmatpush1.bf16.msra.mxu1 %v1369_v1 }
 0x1c0   :  { %1009 = vmatprep.subr.bf16.mxu1 %v1374_v20 }
 0x1c3   :  { %1010 = vmatpush1.bf16.msra.mxu1 %v1372_v21 }
 0x1c4   :  { %1011 = vmatprep.subr.bf16.mxu1 %v1377_v22 }
 0x1c7   :  { %1012 = vmatpush1.bf16.msra.mxu1 %v1375_v23 }
 0x25d   :  { %v610_v5 = vpop.f32.mrb[0].mxu1 }
 0x25e   :  { %v611_v6 = vadd.f32 %v610_v5, %v409_v3  ;;  %v612_v7 = vpop.f32.mrb[1].mxu1 }
 0x25f   :  { %v613_v8 = vadd.f32 %v612_v7, %v413_v4  ;;  %v614_v9 = vpop.f32.mrb[2].mxu1 }
 0x260   :  { %1039 = vst [vmem:[#allocation14] sm:$0xff] %v611_v6  ;;  %v615_v11 = vpop.f32.mrb[3].mxu1 }
 0x261   :  { %v617_v13 = vmul.f32 0.5, %v613_v8  ;;  %1040 = vst [vmem:[#allocation16] sm:$0xff] %v613_v8 }
 0x263   :  { %v618_v14 = vmul.f32 1.442695, %v617_v13 }
 0x265   :  { %1378 = vpow2.f32 %v618_v14 }
 0x26f   :  { %v1379_v16 = vpop.eup %1378 }
 0x270   :  { %v621_v17 = vmul.f32 %v1379_v16, %v620_v15 }
 0x272   :  { %v622_v18 = vadd.f32 %v621_v17, %v611_v6 }
 0x274   :  { %v623_v19 = vpack.c.bf16 %v622_v18, %v622_v18 }
 0x276   :  { %765 = vmatmul.mubr.bf16.vlgmr.msra.gmra.mrb[4].mxu0 %v623_v19 }
 0x349   :  { %v766_v27 = vpop.f32.mrb[4].mxu0 }
 0x34a   :  { %v767_v28 = vadd.f32 %v766_v27, %v645_v25  ;;  %v768_v29 = vpop.f32.mrb[5].mxu0 }
 0x34b   :  { %v769_v30 = vadd.f32 %v768_v29, %v649_v26  ;;  %v770_v31 = vpop.f32.mrb[6].mxu0 }
 0x34c   :  { %v773_v32 = vmax.f32 %v767_v28, 0.0  ;;  %v771_v33 = vpop.f32.mrb[7].mxu0 }
 0x34d   :  { %v774_v34 = vmax.f32 %v769_v30, 0.0 }
 0x34e   :  { %v775_v36 = vpack.c.bf16 %v773_v32, %v773_v32 }
 0x34f   :  { %v776_v35 = vpack.c.bf16 %v774_v34, %v774_v34 }
 0x351   :  { %1013 = vmatprep.mubr.bf16.mxu1 %v776_v35 }
 0x352   :  { %1014 = vmatmul.mubr.bf16.vlgmr.msra.gmra.mrb[4].mxu1 %v775_v36 }
 0x425   :  { %v1015_v40 = vpop.f32.mrb[4].mxu1 }
 0x426   :  { %v1016_v41 = vadd.f32 %v1015_v40, %v814_v38  ;;  %v1017_v42 = vpop.f32.mrb[5].mxu1 }
 0x427   :  { %v1018_v43 = vadd.f32 %v1017_v42, %v818_v39  ;;  %v1019_v44 = vpop.f32.mrb[6].mxu1 }
 0x428   :  { %v1020_v45 = vpop.f32.mrb[7].mxu1 }
 0x429   :  { %v1022_v46 = vmax.f32 %v1016_v41, %v1018_v43 }
 0x42b   :  { %1023 = vmax.xlane.f32.xlu0 %v1022_v46 }
 0x4b8   :  { %v1024_v47 = vpop.xlane.xlu0 %1023 }
 0x4b9   :  { %v1025_v48 = vsub.f32 %v1016_v41, %v1024_v47  ;;  %v1026_v49 = vsub.f32 %v1018_v43, %v1024_v47 }
 0x4bb   :  { %v1027_v50 = vmul.f32 1.442695, %v1025_v48  ;;  %v1029_v51 = vmul.f32 1.442695, %v1026_v49 }
 0x4bd   :  { %1380 = vpow2.f32 %v1027_v50 }
 0x4be   :  { %1382 = vpow2.f32 %v1029_v51 }
 0x4c7   :  { %v1381_v52 = vpop.eup %1380 }
 0x4c8   :  { %v1383_v53 = vpop.eup %1382 }
 0x4c9   :  { %v1031_v10 = vadd.f32 %v1383_v53, %v1381_v52 }
 0x4cb   :  { %1032 = vadd.xlane.f32.xlu0 %v1031_v10 }
 0x4cc   :  { %1529 = shalt.err (!%p1526_p10)
}
 0x4cd   :  { %s1530_s1 = scalar_lea.hbm %s1828_s11, 128 }
 0x4ce   :  { %p1531_p11 = scmp.ne.s32.totalorder %s1828_s11, %s1530_s1  ;;  %p1534_p12 = scmp.lt.u32.totalorder %s1530_s1, %s1828_s11 }
 0x4d0   :  { %p1536_p13 = pnand %p1534_p12, %p1531_p11 }
 0x4d2   :  { %1539 = shalt.err (!%p1536_p13)
}
 0x4d3   :  { %1060 = dma.vmem_to_hbm [thread:$0]  %s1058_s9, 128, %s1828_s11, [#allocation15]  }
 0x4d4   :  { %s1606_s14 = smov [#allocation16]  }
 0x4d5   :  { %s1067_s15 = sshll.u32 %s1606_s14, 4  ;;  %s1068_s15 = int_to_ptr.vmem [resolvable:$true] %s1067_s15 }
 0x4d6   :  { %s1540_s0 = scalar_lea.vmem %s1068_s15, 128  ;;  %p1545_p1 = scmp.lt.s32.totalorder %s1068_s15, %s1068_s15 }
 0x4d7   :  { %p1541_p0 = scmp.ne.s32.totalorder %s1068_s15, %s1540_s0  ;;  %p1546_p2 = scmp.lt.s32.totalorder %s1540_s0, %s1540_s0 }
 0x4d9   :  { %p1547_p3 = por %p1546_p2, %p1545_p1 }
 0x4db   :  { %p1548_p4 = pnand %p1547_p3, %p1541_p0 }
 0x4dd   :  { %1551 = shalt.err (!%p1548_p4)
}
 0x4de   :  { %s1552_s19 = scalar_lea.hbm %s1829_s12, 128 }
 0x4df   :  { %p1553_p5 = scmp.ne.s32.totalorder %s1829_s12, %s1552_s19  ;;  %p1556_p6 = scmp.lt.u32.totalorder %s1552_s19, %s1829_s12 }
 0x4e1   :  { %p1558_p7 = pnand %p1556_p6, %p1553_p5 }
 0x4e3   :  { %1561 = shalt.err (!%p1558_p7)
}
 0x4e4   :  { %1070 = dma.vmem_to_hbm [thread:$0]  %s1068_s15, 128, %s1829_s12, [#allocation15]  }
 0x4e5   :  { %s1607_s27 = smov [#allocation13]  }
 0x4e6   :  { %s1047_s5 = sshll.u32 %s1607_s27, 4  ;;  %s1048_s5 = int_to_ptr.vmem [resolvable:$true] %s1047_s5 }
 0x4e7   :  { %s1562_s20 = scalar_lea.vmem %s1048_s5, 256  ;;  %p1567_p9 = scmp.lt.s32.totalorder %s1048_s5, %s1048_s5 }
 0x4e8   :  { %p1563_p8 = scmp.ne.s32.totalorder %s1048_s5, %s1562_s20  ;;  %p1568_p10 = scmp.lt.s32.totalorder %s1562_s20, %s1562_s20 }
 0x4ea   :  { %p1569_p11 = por %p1568_p10, %p1567_p9 }
 0x4ec   :  { %p1570_p12 = pnand %p1569_p11, %p1563_p8 }
 0x558   :  { %v1033_v12 = vpop.xlane.xlu0 %1032 }
 0x559   :  { %1384 = vrcp.f32 %v1033_v12 }
 0x563   :  { %v1385_v54 = vpop.eup %1384 }
 0x564   :  { %v1035_v55 = vmul.f32 %v1385_v54, %v1381_v52  ;;  %v1036_v56 = vmul.f32 %v1385_v54, %v1383_v53 }
 0x566   :  { %1037 = vst [vmem:[#allocation13] sm:$0xff] %v1035_v55  ;;  %1038 = vst [vmem:[#allocation13 + $0x8] sm:$0xff] %v1036_v56 }
 0x567   :  { %1573 = shalt.err (!%p1570_p12)
}
 0x568   :  { %s1574_s12 = scalar_lea.hbm %s1827_s10, 256 }
 0x569   :  { %p1575_p13 = scmp.ne.s32.totalorder %s1827_s10, %s1574_s12  ;;  %p1578_p0 = scmp.lt.u32.totalorder %s1574_s12, %s1827_s10 }
 0x56b   :  { %p1580_p1 = pnand %p1578_p0, %p1575_p13 }
 0x56d   :  { %1583 = shalt.err (!%p1580_p1)
}
 0x56e   :  { %1050 = dma.vmem_to_hbm [thread:$0]  %s1048_s5, 256, %s1827_s10, [#allocation4]  }
 0x56f   :  { %1592 = dma.done.wait [#allocation4], 256  }
 0x570   :  { %1593 = vsyncadd [#allocation4], 4294967040 }
 0x571   :  { %1594 = dma.done.wait [#allocation15], 256  }
 0x572   :  { %1595 = vsyncadd [#allocation15], 4294967040 }
 0x573   :  { %1080 = vsyncpa [#allocation3], 1 }
 0x574   :  { %1081 = vsyncpa [#allocation6], 1 }
 0x575   :  { %1082 = vsyncpa [#allocation9], 1 }
 0x576   :  { %1083 = vsyncpa [#allocation12], 1 }
 0x577   :  { %1084 = vsyncpa [#allocation4], 1 }
 0x578   :  { %1085 = vsyncpa [#allocation15], 1 }

</bundles_post_ra>
